<compile_context>
chip_gen: v7x
topology: tpu7x:2x2x1
jax: 0.10.0
libtpu: 0.0.40
codegen_flags: <defaults>
</compile_context>

<pallas_src>
import jax
import jax.numpy as jnp
from jax.experimental import pallas as pl
from jax.experimental.pallas import tpu as pltpu


def _round_up(x, m):
    return (x + m - 1) // m * m


def _linear_relu_kernel(x_ref, wt_ref, b_ref, o_ref):
    # x_ref : (TM, K)  f32   (K = 5)
    # wt_ref: (K,  N)  f32   (N = 8), VMEM-resident across the whole grid
    # b_ref : (1,  N)  f32,  VMEM-resident
    # o_ref : (TM, N)  f32
    x = x_ref[...]
    wt = wt_ref[...]
    k_dim = x.shape[1]

    # Start the accumulator from the broadcast bias, then do K VPU MACs
    # (avoids the MXU push/pop round trip for a tiny 5x8 contraction).
    acc = jnp.broadcast_to(b_ref[...], o_ref.shape).astype(jnp.float32)
    for k in range(k_dim):                      # static unroll, K = 5
        acc = acc + x[:, k:k + 1] * wt[k:k + 1, :]   # (TM,1)*(1,N) -> (TM,N)

    o_ref[...] = jnp.maximum(acc, 0.0).astype(o_ref.dtype)


def linear_relu(x_flat, w, b, *, tm_max=2048):
    """x_flat: (M, K) f32, w: (N, K) f32 (nn.Linear layout), b: (N,) f32 -> (M, N) f32."""
    M, K = x_flat.shape
    N = w.shape[0]

    # Row-tile size: multiple of 8 sublanes, capped so the (TM,128)-padded VMEM tiles
    # (double-buffered in and out) stay a few MiB even on v7x's 64 MiB VMEM.
    tm = min(tm_max, _round_up(max(M, 8), 8))
    m_pad = _round_up(M, tm)
    if m_pad != M:
        x_flat = jnp.pad(x_flat, ((0, m_pad - M), (0, 0)))

    wt = w.T                       # (K, N) — 160-byte one-time transpose outside the kernel
    b2 = b.reshape(1, N)

    out = pl.pallas_call(
        _linear_relu_kernel,
        out_shape=jax.ShapeDtypeStruct((m_pad, N), jnp.float32),
        grid=(m_pad // tm,),
        in_specs=[
            pl.BlockSpec((tm, K), lambda i: (i, 0)),   # streamed row tiles
            pl.BlockSpec((K, N), lambda i: (0, 0)),    # weight: constant block -> stays resident
            pl.BlockSpec((1, N), lambda i: (0, 0)),    # bias:   constant block -> stays resident
        ],
        out_specs=pl.BlockSpec((tm, N), lambda i: (i, 0)),
        compiler_params=pltpu.CompilerParams(
            dimension_semantics=("parallel",),         # independent row tiles; v7x uses both TCs
        ),
    )(x_flat, wt, b2)

    return out[:M] if m_pad != M else out


@jax.jit
def model_forward(x1, w, b):
    """x1: (B, S, 5), w: (8, 5), b: (8,) -> relu(linear(x1)) of shape (B, S, 8)."""
    B, S, K = x1.shape
    N = w.shape[0]
    x_flat = x1.reshape(B * S, K)
    out = linear_relu(x_flat, w, b)
    return out.reshape(B, S, N)


if __name__ == "__main__":
    key = jax.random.PRNGKey(0)
    k_x, k_w, k_b = jax.random.split(key, 3)

    in_features, out_features = 5, 8
    B, S = 2, 16  # small shapes consistent with a (…, 5) -> (…, 8) linear

    # Deterministic parameter init, mimicking nn.Linear's uniform(-1/sqrt(fan_in), 1/sqrt(fan_in)).
    bound = 1.0 / (in_features ** 0.5)
    w = jax.random.uniform(k_w, (out_features, in_features), jnp.float32, -bound, bound)
    b = jax.random.uniform(k_b, (out_features,), jnp.float32, -bound, bound)

    x1 = jax.random.normal(k_x, (B, S, in_features), jnp.float32)

    out = model_forward(x1, w, b)
    jax.block_until_ready(out)

    # sanity check against plain-JAX reference
    ref = jnp.maximum(jnp.einsum("bsk,nk->bsn", x1, w) + b, 0.0)
    assert out.shape == (B, S, out_features)
    assert jnp.allclose(out, ref, atol=1e-5), "mismatch vs reference"

    print("KERNEL_OK")
</pallas_src>

<mosaic_0001>
module attributes {stable_mosaic.version = 11 : i64} {
  func.func @_linear_relu_kernel(%arg0: i32, %arg1: memref<32x5xf32, #tpu.memory_space<vmem>>, %arg2: memref<5x8xf32, #tpu.memory_space<vmem>>, %arg3: memref<1x8xf32, #tpu.memory_space<vmem>>, %arg4: memref<32x8xf32, #tpu.memory_space<vmem>>) attributes {dimension_semantics = [#tpu.dimension_semantics<parallel>], iteration_bounds = array<i64: 1>, scalar_prefetch = 0 : i64, scratch_operands = 0 : i64, tpu.core_type = #tpu.core_type<tc>, window_params = [{transform_indices = @transform_0, window_bounds = array<i64: 32, 5>}, {pipeline_mode = #tpu.pipeline_mode<synchronous>, transform_indices = @transform_1, window_bounds = array<i64: 5, 8>}, {pipeline_mode = #tpu.pipeline_mode<synchronous>, transform_indices = @transform_2, window_bounds = array<i64: 1, 8>}, {transform_indices = @transform_3, window_bounds = array<i64: 32, 8>}]} {
    %c0 = arith.constant 0 : index
    %c0_0 = arith.constant 0 : index
    %0 = vector.load %arg1[%c0, %c0_0] : memref<32x5xf32, #tpu.memory_space<vmem>>, vector<32x5xf32>
    %c0_1 = arith.constant 0 : index
    %c0_2 = arith.constant 0 : index
    %1 = vector.load %arg2[%c0_1, %c0_2] : memref<5x8xf32, #tpu.memory_space<vmem>>, vector<5x8xf32>
    %c0_3 = arith.constant 0 : index
    %c0_4 = arith.constant 0 : index
    %2 = vector.load %arg3[%c0_3, %c0_4] : memref<1x8xf32, #tpu.memory_space<vmem>>, vector<1x8xf32>
    %3 = vector.shape_cast %2 : vector<1x8xf32> to vector<1x8xf32>
    %4 = vector.broadcast %3 : vector<1x8xf32> to vector<32x8xf32>
    %5 = vector.extract_strided_slice %0 {offsets = [0, 0], sizes = [32, 1], strides = [1, 1]} : vector<32x5xf32> to vector<32x1xf32>
    %6 = vector.extract_strided_slice %1 {offsets = [0, 0], sizes = [1, 8], strides = [1, 1]} : vector<5x8xf32> to vector<1x8xf32>
    %7 = vector.broadcast %5 : vector<32x1xf32> to vector<32x8xf32>
    %8 = vector.broadcast %6 : vector<1x8xf32> to vector<32x8xf32>
    %9 = arith.mulf %7, %8 : vector<32x8xf32>
    %10 = arith.addf %4, %9 : vector<32x8xf32>
    %11 = vector.extract_strided_slice %0 {offsets = [0, 1], sizes = [32, 1], strides = [1, 1]} : vector<32x5xf32> to vector<32x1xf32>
    %12 = vector.extract_strided_slice %1 {offsets = [1, 0], sizes = [1, 8], strides = [1, 1]} : vector<5x8xf32> to vector<1x8xf32>
    %13 = vector.broadcast %11 : vector<32x1xf32> to vector<32x8xf32>
    %14 = vector.broadcast %12 : vector<1x8xf32> to vector<32x8xf32>
    %15 = arith.mulf %13, %14 : vector<32x8xf32>
    %16 = arith.addf %10, %15 : vector<32x8xf32>
    %17 = vector.extract_strided_slice %0 {offsets = [0, 2], sizes = [32, 1], strides = [1, 1]} : vector<32x5xf32> to vector<32x1xf32>
    %18 = vector.extract_strided_slice %1 {offsets = [2, 0], sizes = [1, 8], strides = [1, 1]} : vector<5x8xf32> to vector<1x8xf32>
    %19 = vector.broadcast %17 : vector<32x1xf32> to vector<32x8xf32>
    %20 = vector.broadcast %18 : vector<1x8xf32> to vector<32x8xf32>
    %21 = arith.mulf %19, %20 : vector<32x8xf32>
    %22 = arith.addf %16, %21 : vector<32x8xf32>
    %23 = vector.extract_strided_slice %0 {offsets = [0, 3], sizes = [32, 1], strides = [1, 1]} : vector<32x5xf32> to vector<32x1xf32>
    %24 = vector.extract_strided_slice %1 {offsets = [3, 0], sizes = [1, 8], strides = [1, 1]} : vector<5x8xf32> to vector<1x8xf32>
    %25 = vector.broadcast %23 : vector<32x1xf32> to vector<32x8xf32>
    %26 = vector.broadcast %24 : vector<1x8xf32> to vector<32x8xf32>
    %27 = arith.mulf %25, %26 : vector<32x8xf32>
    %28 = arith.addf %22, %27 : vector<32x8xf32>
    %29 = vector.extract_strided_slice %0 {offsets = [0, 4], sizes = [32, 1], strides = [1, 1]} : vector<32x5xf32> to vector<32x1xf32>
    %30 = vector.extract_strided_slice %1 {offsets = [4, 0], sizes = [1, 8], strides = [1, 1]} : vector<5x8xf32> to vector<1x8xf32>
    %31 = vector.broadcast %29 : vector<32x1xf32> to vector<32x8xf32>
    %32 = vector.broadcast %30 : vector<1x8xf32> to vector<32x8xf32>
    %33 = arith.mulf %31, %32 : vector<32x8xf32>
    %34 = arith.addf %28, %33 : vector<32x8xf32>
    %cst = arith.constant 0.000000e+00 : f32
    %35 = vector.broadcast %cst : f32 to vector<32x8xf32>
    %36 = arith.maximumf %34, %35 : vector<32x8xf32>
    %c0_5 = arith.constant 0 : index
    %c0_6 = arith.constant 0 : index
    %37 = vector.load %arg4[%c0_5, %c0_6] : memref<32x8xf32, #tpu.memory_space<vmem>>, vector<32x8xf32>
    tpu.vector_store %arg4[%c0_5, %c0_6], %36 {strides = array<i32>} : memref<32x8xf32, #tpu.memory_space<vmem>>, vector<32x8xf32>,
    return
  }
  func.func @transform_0(%arg0: i32) -> (i32, i32) {
    %c0_i32 = arith.constant 0 : i32
    %c0_i32_0 = arith.constant 0 : i32
    return %arg0, %c0_i32 : i32, i32
  }
  func.func @transform_1(%arg0: i32) -> (i32, i32) {
    %c0_i32 = arith.constant 0 : i32
    %c0_i32_0 = arith.constant 0 : i32
    %c0_i32_1 = arith.constant 0 : i32
    return %c0_i32, %c0_i32_0 : i32, i32
  }
  func.func @transform_2(%arg0: i32) -> (i32, i32) {
    %c0_i32 = arith.constant 0 : i32
    %c0_i32_0 = arith.constant 0 : i32
    %c0_i32_1 = arith.constant 0 : i32
    return %c0_i32, %c0_i32_0 : i32, i32
  }
  func.func @transform_3(%arg0: i32) -> (i32, i32) {
    %c0_i32 = arith.constant 0 : i32
    %c0_i32_0 = arith.constant 0 : i32
    return %arg0, %c0_i32 : i32, i32
  }
}

</mosaic_0001>

<bundles_post_ra>
// kernel: model_forward.1
= control target key start
LH: loop header
LB: loop body
LE: loop exit
PB: predicated region body
PF: predicated region fallthrough
CT: control target
= control target key end

     0   :  { %v199_v0 = vmov 0   ;;  %v200_v5 = vmov 1   ;;  %v201_v6 = vmov 2   ;;  %v202_v7 = vmov 3   ;;  %s258_s0 = inlined_call_operand.vmem [shape: f32[32,5], index: 0, kind: input, shape index: {}]   ;;  %s259_s1 = inlined_call_operand.vmem [shape: f32[5,8], index: 1, kind: input, shape index: {}]   ;;  %s260_s2 = inlined_call_operand.vmem [shape: f32[1,8], index: 2, kind: input, shape index: {}]   ;;  %s261_s3 = inlined_call_operand.vmem [shape: f32[32,8], index: 3, kind: output, shape index: {}]  }
   0x1   :  { %190 = vset.pattern.permute.xlu1 %v199_v0  ;;  %189 = vset.pattern.permute.xlu0 %v199_v0  ;;  %v16_v1 = vld [vmem:[%s258_s0 + $0x10] sm:$0xff]  ;;  %v14_v2 = vld [vmem:[%s258_s0] sm:$0xff]  ;;  %v17_v3 = vld [vmem:[%s258_s0 + $0x18] sm:$0xff]  ;;  %v203_v8 = vmov 4   ;;  %v46_v13 = vlaneseq  ;;  %vm174_vm0 = vcmask 64512  }
   0x2   :  { %38 = vperm.xlu1 %190, %v16_v1   ;;  %28 = vperm.xlu0 %189, %v14_v2   ;;  %v15_v4 = vld [vmem:[%s258_s0 + $0x8] sm:$0xff]  ;;  %v18_v20 = vld [vmem:[%s259_s1] sm:$0x1f] }
   0x3   :  { %v47_v16 = vshrl.u32 %v46_v13, 7  ;;  %v183_v31 = vld [vmem:[%s260_s2] ss:$0 sm:$0xff] }
   0x5   :  { %v48_v19 = vsub.s32 0, %v47_v16  ;;  %v76_v21 = vsub.s32 1, %v47_v16  ;;  %v104_v25 = vsub.s32 2, %v47_v16  ;;  %v160_v32 = vsub.s32 4, %v47_v16 }
   0x6   :  { %43 = vperm.xlu1 %190, %v17_v3   ;;  %33 = vperm.xlu0 %189, %v15_v4   ;;  %v132_v35 = vsub.s32 3, %v47_v16 }
   0x7   :  { %v49_v24 = vrot.slane %v18_v20, %v48_v19  ;;  %v77_v27 = vrot.slane %v18_v20, %v76_v21  ;;  %v105_v30 = vrot.slane %v18_v20, %v104_v25  ;;  %v161_v40 = vrot.slane %v18_v20, %v160_v32 }
   0x8   :  { %v133_v42 = vrot.slane %v18_v20, %v132_v35 }
   0xa   :  { %192 = vset.pattern.permute.xlu1 %v200_v5  ;;  %191 = vset.pattern.permute.xlu0 %v200_v5 }
   0xb   :  { %63 = vperm.xlu1 %192, %v15_v4   ;;  %59 = vperm.xlu0 %191, %v14_v2  }
   0xf   :  { %67 = vperm.xlu1 %192, %v16_v1   ;;  %71 = vperm.xlu0 %191, %v17_v3  }
  0x13   :  { %193 = vset.pattern.permute.xlu1 %v201_v6  ;;  %194 = vset.pattern.permute.xlu0 %v201_v6 }
  0x14   :  { %87 = vperm.xlu1 %193, %v14_v2   ;;  %91 = vperm.xlu0 %194, %v15_v4  }
  0x18   :  { %95 = vperm.xlu1 %193, %v16_v1   ;;  %195 = vset.pattern.permute.xlu0 %v202_v7 }
  0x19   :  { %115 = vperm.xlu0 %195, %v14_v2  }
  0x1c   :  { %99 = vperm.xlu1 %193, %v17_v3  }
  0x1d   :  { %127 = vperm.xlu0 %195, %v17_v3  }
  0x20   :  { %196 = vset.pattern.permute.xlu1 %v202_v7 }
  0x21   :  { %119 = vperm.xlu1 %196, %v15_v4   ;;  %198 = vset.pattern.permute.xlu0 %v203_v8 }
  0x22   :  { %147 = vperm.xlu0 %198, %v15_v4  }
  0x25   :  { %123 = vperm.xlu1 %196, %v16_v1  }
  0x29   :  { %197 = vset.pattern.permute.xlu1 %v203_v8 }
  0x2a   :  { %143 = vperm.xlu1 %197, %v14_v2  }
  0x2e   :  { %151 = vperm.xlu1 %197, %v16_v1  }
  0x32   :  { %155 = vperm.xlu1 %197, %v17_v3  }
  0x81   :  { %v39_v9 = vpop.permute.xlu1 %38  ;;  %v29_v10 = vpop.permute.xlu0 %28 }
  0x82   :  { %v50_v37 = vmul.f32 %v49_v24, %v29_v10  ;;  %v52_v50 = vmul.f32 %v49_v24, %v39_v9 }
  0x84   :  { %v54_v43 = vadd.f32 %v183_v31, %v50_v37  ;;  %v56_v59 = vadd.f32 %v183_v31, %v52_v50 }
  0x85   :  { %v44_v11 = vpop.permute.xlu1 %43  ;;  %v34_v12 = vpop.permute.xlu0 %33 }
  0x86   :  { %v51_v26 = vmul.f32 %v49_v24, %v34_v12  ;;  %v53_v55 = vmul.f32 %v49_v24, %v44_v11 }
  0x88   :  { %v55_v33 = vadd.f32 %v183_v31, %v51_v26  ;;  %v57_v0 = vadd.f32 %v183_v31, %v53_v55 }
  0x8a   :  { %v64_v14 = vpop.permute.xlu1 %63  ;;  %v60_v15 = vpop.permute.xlu0 %59 }
  0x8b   :  { %v79_v34 = vmul.f32 %v77_v27, %v64_v14  ;;  %v78_v44 = vmul.f32 %v77_v27, %v60_v15 }
  0x8d   :  { %v83_v41 = vadd.f32 %v79_v34, %v55_v33  ;;  %v82_v52 = vadd.f32 %v78_v44, %v54_v43 }
  0x8e   :  { %v68_v17 = vpop.permute.xlu1 %67  ;;  %v72_v18 = vpop.permute.xlu0 %71 }
  0x8f   :  { %v80_v56 = vmul.f32 %v77_v27, %v68_v17  ;;  %v81_v61 = vmul.f32 %v77_v27, %v72_v18 }
  0x91   :  { %v84_v1 = vadd.f32 %v80_v56, %v56_v59  ;;  %v85_v7 = vadd.f32 %v81_v61, %v57_v0 }
  0x93   :  { %v88_v22 = vpop.permute.xlu1 %87  ;;  %v92_v23 = vpop.permute.xlu0 %91 }
  0x94   :  { %v107_v39 = vmul.f32 %v105_v30, %v92_v23  ;;  %v106_v53 = vmul.f32 %v105_v30, %v88_v22 }
  0x96   :  { %v111_v46 = vadd.f32 %v107_v39, %v83_v41  ;;  %v110_v62 = vadd.f32 %v106_v53, %v82_v52 }
  0x97   :  { %v96_v28 = vpop.permute.xlu1 %95 }
  0x98   :  { %v116_v29 = vpop.permute.xlu0 %115  ;;  %v108_v63 = vmul.f32 %v105_v30, %v96_v28 }
  0x99   :  { %v134_v58 = vmul.f32 %v133_v42, %v116_v29 }
  0x9a   :  { %v112_v8 = vadd.f32 %v108_v63, %v84_v1 }
  0x9b   :  { %v100_v36 = vpop.permute.xlu1 %99  ;;  %v138_v3 = vadd.f32 %v134_v58, %v110_v62 }
  0x9c   :  { %v128_v38 = vpop.permute.xlu0 %127  ;;  %v109_v4 = vmul.f32 %v105_v30, %v100_v36 }
  0x9d   :  { %v137_v10 = vmul.f32 %v133_v42, %v128_v38 }
  0x9e   :  { %v113_v12 = vadd.f32 %v109_v4, %v85_v7 }
  0xa0   :  { %v120_v45 = vpop.permute.xlu1 %119  ;;  %v141_v18 = vadd.f32 %v137_v10, %v113_v12 }
  0xa1   :  { %v135_v47 = vmul.f32 %v133_v42, %v120_v45  ;;  %v148_v48 = vpop.permute.xlu0 %147 }
  0xa2   :  { %v163_v49 = vmul.f32 %v161_v40, %v148_v48 }
  0xa3   :  { %v139_v51 = vadd.f32 %v135_v47, %v111_v46 }
  0xa4   :  { %v124_v54 = vpop.permute.xlu1 %123 }
  0xa5   :  { %v167_v57 = vadd.f32 %v163_v49, %v139_v51  ;;  %v136_v5 = vmul.f32 %v133_v42, %v124_v54 }
  0xa7   :  { %v171_v60 = vmax.f32 %v167_v57, 0.0  ;;  %v140_v13 = vadd.f32 %v136_v5, %v112_v8 }
  0xa9   :  { %176 = vst.msk [vmem:[%s261_s3 + $0x8] sm:$0xff] %vm174_vm0, %v171_v60  ;;  %v144_v2 = vpop.permute.xlu1 %143 }
  0xaa   :  { %v162_v6 = vmul.f32 %v161_v40, %v144_v2 }
  0xac   :  { %v166_v9 = vadd.f32 %v162_v6, %v138_v3 }
  0xad   :  { %v152_v11 = vpop.permute.xlu1 %151 }
  0xae   :  { %v170_v14 = vmax.f32 %v166_v9, 0.0  ;;  %v164_v15 = vmul.f32 %v161_v40, %v152_v11 }
  0xb0   :  { %175 = vst.msk [vmem:[%s261_s3] sm:$0xff] %vm174_vm0, %v170_v14  ;;  %v168_v16 = vadd.f32 %v164_v15, %v140_v13 }
  0xb1   :  { %v156_v17 = vpop.permute.xlu1 %155 }
  0xb2   :  { %v172_v19 = vmax.f32 %v168_v16, 0.0  ;;  %v165_v20 = vmul.f32 %v161_v40, %v156_v17 }
  0xb4   :  { %177 = vst.msk [vmem:[%s261_s3 + $0x10] sm:$0xff] %vm174_vm0, %v172_v19  ;;  %v169_v21 = vadd.f32 %v165_v20, %v141_v18 }
  0xb6   :  { %v173_v22 = vmax.f32 %v169_v21, 0.0 }
  0xb8   :  { %178 = vst.msk [vmem:[%s261_s3 + $0x18] sm:$0xff] %vm174_vm0, %v173_v22 }

</bundles_post_ra>
